<compile_context>
chip_gen: v5e
topology: v5e:2x2
jax: 0.10.0
libtpu: 0.0.40
codegen_flags: <defaults>
</compile_context>

<pallas_src>
import numpy as np
import jax
import jax.numpy as jnp
from jax.experimental import pallas as pl
from jax.experimental.pallas import tpu as pltpu


# ----------------------------------------------------------------------------
# Plain-JAX glue: batch_rodrigues + camera construction (parameter setup)
# ----------------------------------------------------------------------------
def batch_rodrigues(rot_vecs, epsilon=1e-8):
    """rot_vecs: [N, 3] axis-angle -> [N, 3, 3] rotation matrices."""
    angle = jnp.linalg.norm(rot_vecs + 1e-8, axis=1, keepdims=True)      # [N,1]
    rot_dir = rot_vecs / angle                                           # [N,3]
    cos = jnp.cos(angle)[:, :, None]                                     # [N,1,1]
    sin = jnp.sin(angle)[:, :, None]                                     # [N,1,1]
    rx, ry, rz = rot_dir[:, 0:1], rot_dir[:, 1:2], rot_dir[:, 2:3]
    zeros = jnp.zeros_like(rx)
    K = jnp.concatenate(
        [zeros, -rz, ry, rz, zeros, -rx, -ry, rx, zeros], axis=1
    ).reshape(-1, 3, 3)
    ident = jnp.eye(3, dtype=rot_vecs.dtype)[None]
    return ident + sin * K + (1.0 - cos) * jnp.matmul(K, K)


def get_orthogonal_cameras(n=4, yaw_range=(0, 360), endpoint=False):
    min_yaw, max_yaw = np.radians(yaw_range)
    angles = np.linspace(min_yaw, max_yaw, n, endpoint=endpoint)
    rot_vecs = jnp.asarray([[0.0, a, 0.0] for a in angles], dtype=jnp.float32)
    R = batch_rodrigues(rot_vecs)                                        # [n,3,3]
    extrinsic = jnp.tile(jnp.eye(4, dtype=jnp.float32)[None], (n, 1, 1))
    extrinsic = extrinsic.at[:, :3, :3].set(R)
    Ri = batch_rodrigues(jnp.asarray([[np.pi, 0.0, 0.0]], dtype=jnp.float32))
    Ri = Ri.reshape(3, 3)
    intrinsic = jnp.tile(jnp.eye(4, dtype=jnp.float32)[None], (n, 1, 1))
    intrinsic = intrinsic.at[:, :3, :3].set(Ri)
    return jnp.matmul(intrinsic, extrinsic)                              # [n,4,4]


# ----------------------------------------------------------------------------
# Pallas kernel 1: clip-space vertex transform  v_clip[b] = v_homo @ mvp[b]^T
#   sublane-dense VPU formulation, two views per 8-row output slab:
#     out[8, T] = sum_k mvp_pair[:, k:k+1] * v[k:k+1, :]
# ----------------------------------------------------------------------------
def _vertex_transform_kernel(mvp_ref, v_ref, out_ref):
    # mvp_ref: (8, 4) -- rows 0..3 = view 2p coords 0..3, rows 4..7 = view 2p+1
    # v_ref  : (4, T) -- homogeneous vertex coords, lane-dense
    # out_ref: (8, T)
    acc = mvp_ref[:, 0:1] * v_ref[0:1, :]              # (8,1)*(1,T) -> (8,T)
    for k in range(1, 4):                              # static unroll
        acc = acc + mvp_ref[:, k:k + 1] * v_ref[k:k + 1, :]
    out_ref[...] = acc


def vertex_transform(v, mvp, tile_n=8192):
    """v: [N, 3] vertices, mvp: [B, 4, 4]  ->  v_clip: [B, N, 4]."""
    N = v.shape[0]
    B = mvp.shape[0]
    f32 = jnp.float32

    # F.pad(..., value=1) -> homogeneous coord, then channel-major [4, N]
    v_t = jnp.concatenate([v.astype(f32).T, jnp.ones((1, N), f32)], axis=0)

    # lane-align / tile the vertex axis (gives DMA/compute pipelining and keeps
    # VMEM residency bounded for big meshes)
    tile_n = max(128, (int(tile_n) // 128) * 128)
    n_align = ((N + 127) // 128) * 128
    tile_n = min(tile_n, n_align)
    n_pad = ((N + tile_n - 1) // tile_n) * tile_n
    if n_pad != N:
        v_t = jnp.pad(v_t, ((0, 0), (0, n_pad - N)))

    # pack two views per 8-row slab (pad to an even number of views)
    mvp_f = mvp.astype(f32)
    b_pad = B + (B % 2)
    if b_pad != B:
        mvp_f = jnp.concatenate([mvp_f, jnp.zeros((1, 4, 4), f32)], axis=0)
    npairs = b_pad // 2
    mvp_packed = mvp_f.reshape(npairs * 8, 4)          # row q of pair p = view 2p+q//4, coord q%4

    grid = (n_pad // tile_n, npairs)                   # pair axis last: v block fetched once per lane tile
    out = pl.pallas_call(
        _vertex_transform_kernel,
        out_shape=jax.ShapeDtypeStruct((npairs * 8, n_pad), f32),
        grid=grid,
        in_specs=[
            pl.BlockSpec((8, 4), lambda j, p: (p, 0)),          # mvp pair (tiny VMEM operand)
            pl.BlockSpec((4, tile_n), lambda j, p: (0, j)),     # vertex lane tile
        ],
        out_specs=pl.BlockSpec((8, tile_n), lambda j, p: (p, j)),
        compiler_params=pltpu.CompilerParams(
            dimension_semantics=("parallel", "parallel")),
    )(mvp_packed, v_t)

    # channel-major (B, 4, N) is the perf-friendly layout; transpose only
    # because the module contract is (B, N, 4).
    # TODO(synk): push this transpose to the consumer for large N (it is a full
    #             extra HBM pass over v_clip).
    v_clip_cm = out.reshape(b_pad, 4, n_pad)[:B, :, :N]
    return jnp.transpose(v_clip_cm, (0, 2, 1))


# ----------------------------------------------------------------------------
# Pallas kernel 2: shading + clamp + background composite, planar channel-major
#   inputs (3,T)/(3,T)/(1,T), outputs (3,T)/(3,T); scalar params in SMEM.
# ----------------------------------------------------------------------------
def _shade_composite_kernel(params_ref, c_ref, n_ref, a_ref, img_ref, nrm_ref):
    # params: [lx, ly, lz, bg_r, bg_g, bg_b, ambient_ratio, lambertian_flag]
    lx = params_ref[0]
    ly = params_ref[1]
    lz = params_ref[2]
    ambient = params_ref[6]
    is_lamb = params_ref[7]

    a_raw = a_ref[...]                                  # (1, T)
    mask = (a_raw > 0.0).astype(jnp.float32)            # where(rast[...,3:]>0, ., 0)
    alpha = jnp.clip(a_raw, 0.0, 1.0)                   # (1, T)
    oma = 1.0 - alpha

    nrm01 = (n_ref[...] + 1.0) * 0.5                    # (3, T), normals -> [0,1]
    ndotl = nrm01[0:1, :] * lx + nrm01[1:2, :] * ly + nrm01[2:3, :] * lz
    lam = ambient + (1.0 - ambient) * jnp.maximum(ndotl, 0.0)
    lam = 1.0 + is_lamb * (lam - 1.0)                   # albedo mode -> 1.0 (no recompile)
    shade = mask * lam                                  # (1, T)

    # TODO(synk): dr.antialias (edge antialiasing against the mesh) has no
    #             Pallas equivalent; only the subsequent clamp(0,1) is applied.
    color = jnp.clip(c_ref[...] * shade, 0.0, 1.0)      # (3, T)
    nrm01 = jnp.clip(nrm01, 0.0, 1.0)

    # background composite: x * alpha + bg * (1 - alpha), per-channel
    for ch in range(3):                                 # static unroll, sublane-slice stores
        bg_term = params_ref[3 + ch] * oma              # (1, T)
        img_ref[ch:ch + 1, :] = color[ch:ch + 1, :] * alpha + bg_term
        nrm_ref[ch:ch + 1, :] = nrm01[ch:ch + 1, :] * alpha + bg_term


def shade_and_composite(raster_color, raster_normal, raster_alpha,
                        light_d, bg_color, ambient_ratio, shading_mode,
                        tile=65536):
    B, H, W, _ = raster_color.shape
    P = B * H * W
    f32 = jnp.float32

    # planar channel-major views (XLA handles the small (P,3)->(3,P) transpose)
    c = raster_color.reshape(P, 3).T.astype(f32)        # (3, P)
    n = raster_normal.reshape(P, 3).T.astype(f32)       # (3, P)
    a = raster_alpha.reshape(P, 1).T.astype(f32)        # (1, P)

    # lane-dense tiling: 65536 lanes -> ~3.25 MiB/step in+out, ~6.5 MiB
    # double-buffered: fits the default scoped VMEM on v5e/v6e/v7x.
    tile = max(128, (int(tile) // 128) * 128)
    p_align = ((P + 127) // 128) * 128
    tile = min(tile, p_align)
    p_pad = ((P + tile - 1) // tile) * tile
    if p_pad != P:
        pad = ((0, 0), (0, p_pad - P))
        c = jnp.pad(c, pad)
        n = jnp.pad(n, pad)
        a = jnp.pad(a, pad)

    # scalar params -> SMEM via scalar prefetch (no baked constants, no recompile)
    params = jnp.concatenate([
        jnp.asarray(light_d, f32).reshape(3),
        jnp.asarray(bg_color, f32).reshape(3),
        jnp.asarray([float(ambient_ratio),
                     1.0 if shading_mode == 'lambertian' else 0.0], f32),
    ])                                                   # (8,)

    grid = (p_pad // tile,)
    img, nrm = pl.pallas_call(
        _shade_composite_kernel,
        out_shape=(jax.ShapeDtypeStruct((3, p_pad), f32),
                   jax.ShapeDtypeStruct((3, p_pad), f32)),
        grid_spec=pltpu.PrefetchScalarGridSpec(
            num_scalar_prefetch=1,
            grid=grid,
            in_specs=[
                pl.BlockSpec((3, tile), lambda i, prm: (0, i)),
                pl.BlockSpec((3, tile), lambda i, prm: (0, i)),
                pl.BlockSpec((1, tile), lambda i, prm: (0, i)),
            ],
            out_specs=[
                pl.BlockSpec((3, tile), lambda i, prm: (0, i)),
                pl.BlockSpec((3, tile), lambda i, prm: (0, i)),
            ]),
        compiler_params=pltpu.CompilerParams(
            dimension_semantics=("parallel",)),          # lets v7x shard over 2 TCs
        cost_estimate=pl.CostEstimate(
            flops=int(30 * p_pad), transcendentals=0,
            bytes_accessed=int(13 * p_pad * 4)),         # 7 rows in + 6 rows out
    )(params, c, n, a)

    image = img[:, :P].T.reshape(B, H, W, 3)
    normal = nrm[:, :P].T.reshape(B, H, W, 3)
    return image, normal


# ----------------------------------------------------------------------------
# Forward wrapper (mirrors Renderer.forward, minus the rasterizer itself)
# ----------------------------------------------------------------------------
def renderer_forward(v, mvp, raster_color, raster_normal, raster_alpha,
                     bg_color, light_dir_deg=(0.0, 0.0), ambient_ratio=0.5,
                     shading_mode='lambertian'):
    assert shading_mode in ('albedo', 'lambertian', 'pbr')
    if shading_mode == 'pbr':
        raise NotImplementedError('PBR shading is not implemented')

    # 1) v_clip = bmm(pad(v, 1), mvp^T)  -- Pallas VPU kernel (lane/sublane-dense)
    v_clip = vertex_transform(v, mvp)

    # TODO(synk): dr.rasterize / dr.interpolate / dr.texture have no Pallas
    #             equivalent; `raster_color`, `raster_normal`, `raster_alpha`
    #             stand in for the rasterizer outputs.

    # light direction from self.light_dir (degrees), as in Renderer.shading;
    # fed to the kernel as runtime SMEM scalars (no recompile when it changes).
    ld = np.deg2rad(np.asarray(light_dir_deg, dtype=np.float64))
    light_d = np.asarray(
        [np.cos(ld[0]) * np.sin(ld[1]), -np.sin(ld[0]), np.cos(ld[0]) * np.cos(ld[1])],
        dtype=np.float32)

    # 2) shading + clamp + background composite -- planar Pallas kernel
    image, normal = shade_and_composite(
        raster_color, raster_normal, raster_alpha,
        light_d, bg_color, ambient_ratio, shading_mode)

    # alpha: (rast[...,3:] > 0).float() is a 0/1 mask, so the module's clamp(0,1)
    # is the identity -> pass it through without spending HBM bandwidth on it.
    alpha = raster_alpha

    # TODO(synk): 'uvs' (texc) and 'pix_to_face' (rast[...,3].long()) require the
    #             rasterizer and are not produced here.
    return {'image': image, 'normal': normal, 'alpha': alpha, 'v_clip': v_clip}


# ----------------------------------------------------------------------------
# Plain-JAX reference (for correctness check)
# ----------------------------------------------------------------------------
def reference_forward(v, mvp, raster_color, raster_normal, raster_alpha,
                      bg_color, light_dir_deg, ambient_ratio, shading_mode):
    N = v.shape[0]
    v_homo = jnp.concatenate([v, jnp.ones((N, 1), v.dtype)], axis=-1)
    v_clip = jnp.einsum('nk,bjk->bnj', v_homo, mvp,
                        precision=jax.lax.Precision.HIGHEST)

    normal = (raster_normal + 1.0) / 2.0
    color = jnp.where(raster_alpha > 0.0, raster_color, 0.0)
    if shading_mode == 'lambertian':
        ld = np.deg2rad(np.asarray(light_dir_deg, dtype=np.float64))
        light_d = jnp.asarray(
            [np.cos(ld[0]) * np.sin(ld[1]), -np.sin(ld[0]), np.cos(ld[0]) * np.cos(ld[1])],
            dtype=jnp.float32)
        lam = ambient_ratio + (1.0 - ambient_ratio) * jnp.clip(
            jnp.sum(normal * light_d, axis=-1, keepdims=True), 0.0)
        color = color * lam
    color = jnp.clip(color, 0.0, 1.0)
    normal = jnp.clip(normal, 0.0, 1.0)
    alpha = jnp.clip(raster_alpha, 0.0, 1.0)
    color = color * alpha + bg_color * (1.0 - alpha)
    normal = normal * alpha + bg_color * (1.0 - alpha)
    return {'image': color, 'normal': normal, 'alpha': alpha, 'v_clip': v_clip}


# ----------------------------------------------------------------------------
if __name__ == "__main__":
    key = jax.random.PRNGKey(0)
    k1, k2, k3, k4 = jax.random.split(key, 4)

    # small shapes
    B, H, W, N = 2, 16, 16, 64

    # mesh vertices + camera mvps (deterministic, in-script)
    v = jax.random.normal(k1, (N, 3), dtype=jnp.float32) * 0.5
    mvp = get_orthogonal_cameras(n=B, yaw_range=(0, 360))                 # [B,4,4]

    # stand-in rasterizer outputs (see TODO(synk) above)
    raster_color = jax.random.uniform(k2, (B, H, W, 3), dtype=jnp.float32)
    nrm = jax.random.normal(k3, (B, H, W, 3), dtype=jnp.float32)
    raster_normal = nrm / (jnp.linalg.norm(nrm, axis=-1, keepdims=True) + 1e-8)
    raster_alpha = (jax.random.uniform(k4, (B, H, W, 1)) > 0.3).astype(jnp.float32)
    bg_color = jnp.ones((3,), dtype=jnp.float32)                          # 'white'

    out = renderer_forward(v, mvp, raster_color, raster_normal, raster_alpha,
                           bg_color, light_dir_deg=(0.0, 0.0),
                           ambient_ratio=0.5, shading_mode='lambertian')
    jax.block_until_ready(out)

    ref = reference_forward(v, mvp, raster_color, raster_normal, raster_alpha,
                            bg_color, (0.0, 0.0), 0.5, 'lambertian')

    assert out['image'].shape == (B, H, W, 3)
    assert out['normal'].shape == (B, H, W, 3)
    assert out['alpha'].shape == (B, H, W, 1)
    assert out['v_clip'].shape == (B, N, 4)
    np.testing.assert_allclose(np.asarray(out['v_clip']), np.asarray(ref['v_clip']),
                               rtol=1e-5, atol=1e-5)
    np.testing.assert_allclose(np.asarray(out['image']), np.asarray(ref['image']),
                               rtol=1e-5, atol=1e-5)
    np.testing.assert_allclose(np.asarray(out['normal']), np.asarray(ref['normal']),
                               rtol=1e-5, atol=1e-5)
    np.testing.assert_allclose(np.asarray(out['alpha']), np.asarray(ref['alpha']),
                               rtol=1e-5, atol=1e-5)

    print("KERNEL_OK")
</pallas_src>

<mosaic_0001>
module attributes {stable_mosaic.version = 11 : i64} {
  func.func @_vertex_transform_kernel(%arg0: i32, %arg1: i32, %arg2: memref<8x4xf32, #tpu.memory_space<vmem>>, %arg3: memref<4x128xf32, #tpu.memory_space<vmem>>, %arg4: memref<8x128xf32, #tpu.memory_space<vmem>>) attributes {dimension_semantics = [#tpu.dimension_semantics<parallel>, #tpu.dimension_semantics<parallel>], iteration_bounds = array<i64: 1, 1>, scalar_prefetch = 0 : i64, scratch_operands = 0 : i64, tpu.core_type = #tpu.core_type<tc>, window_params = [{transform_indices = @transform_0, window_bounds = array<i64: 8, 4>}, {transform_indices = @transform_1, window_bounds = array<i64: 4, 128>}, {transform_indices = @transform_2, window_bounds = array<i64: 8, 128>}]} {
    %c0 = arith.constant 0 : index
    %c0_0 = arith.constant 0 : index
    %0 = vector.load %arg2[%c0, %c0_0] : memref<8x4xf32, #tpu.memory_space<vmem>>, vector<8x1xf32>
    %c0_1 = arith.constant 0 : index
    %c0_2 = arith.constant 0 : index
    %1 = vector.load %arg3[%c0_1, %c0_2] : memref<4x128xf32, #tpu.memory_space<vmem>>, vector<1x128xf32>
    %2 = vector.broadcast %0 : vector<8x1xf32> to vector<8x128xf32>
    %3 = vector.broadcast %1 : vector<1x128xf32> to vector<8x128xf32>
    %4 = arith.mulf %2, %3 : vector<8x128xf32>
    %c0_3 = arith.constant 0 : index
    %c1 = arith.constant 1 : index
    %5 = vector.load %arg2[%c0_3, %c1] : memref<8x4xf32, #tpu.memory_space<vmem>>, vector<8x1xf32>
    %c1_4 = arith.constant 1 : index
    %c0_5 = arith.constant 0 : index
    %6 = vector.load %arg3[%c1_4, %c0_5] : memref<4x128xf32, #tpu.memory_space<vmem>>, vector<1x128xf32>
    %7 = vector.broadcast %5 : vector<8x1xf32> to vector<8x128xf32>
    %8 = vector.broadcast %6 : vector<1x128xf32> to vector<8x128xf32>
    %9 = arith.mulf %7, %8 : vector<8x128xf32>
    %10 = arith.addf %4, %9 : vector<8x128xf32>
    %c0_6 = arith.constant 0 : index
    %c2 = arith.constant 2 : index
    %11 = vector.load %arg2[%c0_6, %c2] : memref<8x4xf32, #tpu.memory_space<vmem>>, vector<8x1xf32>
    %c2_7 = arith.constant 2 : index
    %c0_8 = arith.constant 0 : index
    %12 = vector.load %arg3[%c2_7, %c0_8] : memref<4x128xf32, #tpu.memory_space<vmem>>, vector<1x128xf32>
    %13 = vector.broadcast %11 : vector<8x1xf32> to vector<8x128xf32>
    %14 = vector.broadcast %12 : vector<1x128xf32> to vector<8x128xf32>
    %15 = arith.mulf %13, %14 : vector<8x128xf32>
    %16 = arith.addf %10, %15 : vector<8x128xf32>
    %c0_9 = arith.constant 0 : index
    %c3 = arith.constant 3 : index
    %17 = vector.load %arg2[%c0_9, %c3] : memref<8x4xf32, #tpu.memory_space<vmem>>, vector<8x1xf32>
    %c3_10 = arith.constant 3 : index
    %c0_11 = arith.constant 0 : index
    %18 = vector.load %arg3[%c3_10, %c0_11] : memref<4x128xf32, #tpu.memory_space<vmem>>, vector<1x128xf32>
    %19 = vector.broadcast %17 : vector<8x1xf32> to vector<8x128xf32>
    %20 = vector.broadcast %18 : vector<1x128xf32> to vector<8x128xf32>
    %21 = arith.mulf %19, %20 : vector<8x128xf32>
    %22 = arith.addf %16, %21 : vector<8x128xf32>
    %c0_12 = arith.constant 0 : index
    %c0_13 = arith.constant 0 : index
    %23 = vector.load %arg4[%c0_12, %c0_13] : memref<8x128xf32, #tpu.memory_space<vmem>>, vector<8x128xf32>
    tpu.vector_store %arg4[%c0_12, %c0_13], %22 {strides = array<i32>} : memref<8x128xf32, #tpu.memory_space<vmem>>, vector<8x128xf32>,
    return
  }
  func.func @transform_0(%arg0: i32, %arg1: i32) -> (i32, i32) {
    %c0_i32 = arith.constant 0 : i32
    %c0_i32_0 = arith.constant 0 : i32
    return %arg1, %c0_i32 : i32, i32
  }
  func.func @transform_1(%arg0: i32, %arg1: i32) -> (i32, i32) {
    %c0_i32 = arith.constant 0 : i32
    %c0_i32_0 = arith.constant 0 : i32
    return %c0_i32, %arg0 : i32, i32
  }
  func.func @transform_2(%arg0: i32, %arg1: i32) -> (i32, i32) {
    %c0_i32 = arith.constant 0 : i32
    return %arg1, %arg0 : i32, i32
  }
}

</mosaic_0001>

<bundles_post_ra>
// kernel: tpu_custom_call.1
= control target key start
LH: loop header
LB: loop body
LE: loop exit
PB: predicated region body
PF: predicated region fallthrough
CT: control target
= control target key end

     0   :  { %v102_v1 = vmov 0   ;;  %v103_v2 = vmov 2   ;;  %s140_s0 = inlined_call_operand.vmem [shape: f32[8,4], index: 0, kind: input, shape index: {}]   ;;  %s141_s1 = inlined_call_operand.vmem [shape: f32[4,128], index: 1, kind: input, shape index: {}]   ;;  %s142_s2 = inlined_call_operand.hbm [shape: f32[8,128], index: 2, kind: output, shape index: {}]  }
   0x1   :  { %v12_v0 = vld [vmem:[%s140_s0] sm:$0xff]  ;;  %67 = vset.pattern.permute.xlu0 %v102_v1  ;;  %69 = vset.pattern.permute.xlu1 %v103_v2 }
   0x2   :  { %16 = vperm.xlu0 %67, %v12_v0   ;;  %31 = vperm.xlu1 %69, %v12_v0  }
   0x3   :  { %7 = vsyncpa [#allocation3], 0  ;;  %v104_v3 = vmov 1   ;;  %v105_v4 = vmov 3   ;;  %v72_v7 = vld [vmem:[%s141_s1] ss:$0 sm:$0xff] }
   0x4   :  { %v74_v8 = vld [vmem:[%s141_s1 + $0x1] ss:$0 sm:$0xff]  ;;  %v73_v9 = vld [vmem:[%s141_s1 + $0x2] ss:$0 sm:$0xff]  ;;  %v75_v10 = vld [vmem:[%s141_s1 + $0x3] ss:$0 sm:$0xff] }
   0x5   :  { %s106_s18 = smov [#allocation2]   ;;  %s53_s22 = sshll.u32 %s142_s2, 4  ;;  %s54_s22 = int_to_ptr.hbm [resolvable:$true] %s53_s22 }
   0x6   :  { %s51_s19 = sshll.u32 %s106_s18, 4  ;;  %s52_s19 = int_to_ptr.vmem [resolvable:$true] %s51_s19 }
   0xa   :  { %68 = vset.pattern.permute.xlu0 %v104_v3  ;;  %70 = vset.pattern.permute.xlu1 %v105_v4 }
   0xb   :  { %23 = vperm.xlu0 %68, %v12_v0   ;;  %39 = vperm.xlu1 %70, %v12_v0  }
  0x13   :  { %71 = vset.pattern.permute.xlu0 %v105_v4 }
  0x74   :  { %v17_v5 = vpop.permute.xlu0 %16  ;;  %v32_v6 = vpop.permute.xlu1 %31 }
  0x75   :  { %v20_v13 = vmul.f32 %v72_v7, %v17_v5  ;;  %v35_v15 = vmul.f32 %v73_v9, %v32_v6 }
  0x7d   :  { %v24_v11 = vpop.permute.xlu0 %23  ;;  %v40_v12 = vpop.permute.xlu1 %39 }
  0x7e   :  { %v27_v14 = vmul.f32 %v74_v8, %v24_v11  ;;  %v43_v17 = vmul.f32 %v75_v10, %v40_v12 }
  0x80   :  { %v28_v16 = vadd.f32 %v27_v14, %v20_v13 }
  0x82   :  { %v36_v18 = vadd.f32 %v35_v15, %v28_v16 }
  0x84   :  { %v44_v19 = vadd.f32 %v43_v17, %v36_v18 }
  0x86   :  { %45 = vst [vmem:[#allocation2] sm:$0xff] %v44_v19 }
  0x87   :  { %56 = dma.vmem_to_hbm [thread:$0]  %s52_s19, 128, %s54_s22, [#allocation3]  }
  0x88   :  { %100 = dma.done.wait [#allocation3], 128  }
  0x89   :  { %101 = vsyncadd [#allocation3], 4294967168 }
  0x8a   :  { %61 = vsyncpa [#allocation3], 1 }

</bundles_post_ra>
